<compile_context>
chip_gen: v7x
topology: tpu7x:2x2x1
jax: 0.10.0
libtpu: 0.0.40
codegen_flags: <defaults>
</compile_context>

<pallas_src>
import jax
import jax.numpy as jnp
from jax.experimental import pallas as pl
from jax.experimental.pallas import tpu as pltpu


def _make_dma_copy_kernel(chunk_rows, n_chunks, slab_rows):
    """Build a kernel that copies (slab_rows, lanes) HBM->HBM in n_chunks DMAs."""

    def kernel(x_ref, o_ref, sem):
        copies = []
        for k in range(n_chunks):                     # static Python loop
            start = k * chunk_rows
            size = min(chunk_rows, slab_rows - start)
            cp = pltpu.make_async_copy(
                x_ref.at[pl.ds(start, size)],
                o_ref.at[pl.ds(start, size)],
                sem.at[k],
            )
            cp.start()
            copies.append(cp)
        for cp in copies:
            cp.wait()

    return kernel


def _choose_slab(total):
    """Pick a lane-dense 2-D view (rows, lanes) of `total` contiguous elements.

    Prefer wide, 128-multiple lane widths; among the valid widths prefer one
    that leaves >= 8 rows so the copy can be split into several in-flight
    DMAs.  No sublane-alignment requirement: DMA is layout-agnostic here.
    """
    candidates = [l for l in (4096, 2048, 1024, 512, 256, 128) if total % l == 0]
    if not candidates:
        return None
    for lanes in candidates:
        if total // lanes >= 8:
            return total // lanes, lanes
    lanes = candidates[0]
    return total // lanes, lanes


def flatten_layer(x, num_features, copy_through_kernel=True):
    """Equivalent of torch FlattenLayer: x.view(-1, num_features)."""
    total = 1
    for d in x.shape:
        total *= d
    assert total % num_features == 0, "num_features must divide total elements"
    rows = total // num_features

    if not copy_through_kernel:
        # Production path: a flatten is metadata only, no kernel needed.
        return jnp.reshape(x, (rows, num_features))

    slab = _choose_slab(total)
    if slab is None:
        # Any contiguous 2-D view is DMA-able; use the output view itself so
        # the kernel path is never silently dropped.
        slab_rows, lanes = rows, num_features
    else:
        slab_rows, lanes = slab

    x2d = jnp.reshape(x, (slab_rows, lanes))          # metadata only

    # A handful of big DMAs: enough to overlap descriptor issue with transfer
    # and engage multiple copy engines, few enough that each stays large.
    n_chunks = max(1, min(8, slab_rows))
    chunk_rows = pl.cdiv(slab_rows, n_chunks)
    n_chunks = pl.cdiv(slab_rows, chunk_rows)         # drop empty tail chunks

    itemsize = jnp.dtype(x.dtype).itemsize
    total_bytes = total * itemsize

    out = pl.pallas_call(
        _make_dma_copy_kernel(chunk_rows, n_chunks, slab_rows),
        out_shape=jax.ShapeDtypeStruct((slab_rows, lanes), x.dtype),
        in_specs=[pl.BlockSpec(memory_space=pl.ANY)],   # raw HBM ref, no auto-DMA
        out_specs=pl.BlockSpec(memory_space=pl.ANY),    # output written via DMA
        scratch_shapes=[pltpu.SemaphoreType.DMA((n_chunks,))],
        cost_estimate=pl.CostEstimate(
            flops=0, transcendentals=0, bytes_accessed=2 * total_bytes),
    )(x2d)

    return jnp.reshape(out, (rows, num_features))     # metadata only


if __name__ == "__main__":
    key = jax.random.PRNGKey(0)
    # Small NCHW input: batch=2, channels=4, spatial=16x16.
    B, C, H, W = 2, 4, 16, 16
    num_features = C * H * W  # 1024
    x = jax.random.normal(key, (B, C, H, W), dtype=jnp.float32)

    y = jax.jit(flatten_layer, static_argnums=(1,))(x, num_features)
    y = jax.block_until_ready(y)

    # Verify against the reference semantics of x.view(-1, num_features).
    y_ref = jnp.reshape(x, (-1, num_features))
    assert y.shape == (B, num_features), y.shape
    assert y.dtype == x.dtype
    assert jnp.array_equal(y, y_ref)

    print("KERNEL_OK")
</pallas_src>

<mosaic_0001>
module attributes {stable_mosaic.version = 11 : i64} {
  func.func @kernel(%arg0: memref<8x256xf32, #tpu.memory_space<any>>, %arg1: memref<8x256xf32, #tpu.memory_space<any>>, %arg2: memref<8x!tpu.dma_semaphore, #tpu.memory_space<semaphore_mem>>) attributes {dimension_semantics = [], scalar_prefetch = 0 : i64, scratch_operands = 1 : i64, tpu.core_type = #tpu.core_type<tc>} {
    %c0_i32 = arith.constant 0 : i32
    %c0_i32_0 = arith.constant 0 : i32
    %c0_i32_1 = arith.constant 0 : i32
    %0 = tpu.memref_slice %arg0[%c0_i32_0, %c0_i32_1] : memref<8x256xf32, #tpu.memory_space<any>> -> memref<1x256xf32, #tpu.memory_space<any>>
    %c0_i32_2 = arith.constant 0 : i32
    %c0_i32_3 = arith.constant 0 : i32
    %1 = tpu.memref_slice %arg1[%c0_i32_2, %c0_i32_3] : memref<8x256xf32, #tpu.memory_space<any>> -> memref<1x256xf32, #tpu.memory_space<any>>
    %2 = tpu.memref_slice %arg2[%c0_i32] : memref<8x!tpu.dma_semaphore, #tpu.memory_space<semaphore_mem>> -> memref<1x!tpu.dma_semaphore, #tpu.memory_space<semaphore_mem>>
    %3 = tpu.memref_squeeze %2 : memref<1x!tpu.dma_semaphore, #tpu.memory_space<semaphore_mem>> -> memref<!tpu.dma_semaphore, #tpu.memory_space<semaphore_mem>>
    tpu.enqueue_dma source(%0 : memref<1x256xf32, #tpu.memory_space<any>>) target(%1 : memref<1x256xf32, #tpu.memory_space<any>>) target_semaphore(%3 : memref<!tpu.dma_semaphore, #tpu.memory_space<semaphore_mem>>)
    %c1_i32 = arith.constant 1 : i32
    %c1_i32_4 = arith.constant 1 : i32
    %c0_i32_5 = arith.constant 0 : i32
    %4 = tpu.memref_slice %arg0[%c1_i32_4, %c0_i32_5] : memref<8x256xf32, #tpu.memory_space<any>> -> memref<1x256xf32, #tpu.memory_space<any>>
    %c1_i32_6 = arith.constant 1 : i32
    %c0_i32_7 = arith.constant 0 : i32
    %5 = tpu.memref_slice %arg1[%c1_i32_6, %c0_i32_7] : memref<8x256xf32, #tpu.memory_space<any>> -> memref<1x256xf32, #tpu.memory_space<any>>
    %6 = tpu.memref_slice %arg2[%c1_i32] : memref<8x!tpu.dma_semaphore, #tpu.memory_space<semaphore_mem>> -> memref<1x!tpu.dma_semaphore, #tpu.memory_space<semaphore_mem>>
    %7 = tpu.memref_squeeze %6 : memref<1x!tpu.dma_semaphore, #tpu.memory_space<semaphore_mem>> -> memref<!tpu.dma_semaphore, #tpu.memory_space<semaphore_mem>>
    tpu.enqueue_dma source(%4 : memref<1x256xf32, #tpu.memory_space<any>>) target(%5 : memref<1x256xf32, #tpu.memory_space<any>>) target_semaphore(%7 : memref<!tpu.dma_semaphore, #tpu.memory_space<semaphore_mem>>)
    %c2_i32 = arith.constant 2 : i32
    %c2_i32_8 = arith.constant 2 : i32
    %c0_i32_9 = arith.constant 0 : i32
    %8 = tpu.memref_slice %arg0[%c2_i32_8, %c0_i32_9] : memref<8x256xf32, #tpu.memory_space<any>> -> memref<1x256xf32, #tpu.memory_space<any>>
    %c2_i32_10 = arith.constant 2 : i32
    %c0_i32_11 = arith.constant 0 : i32
    %9 = tpu.memref_slice %arg1[%c2_i32_10, %c0_i32_11] : memref<8x256xf32, #tpu.memory_space<any>> -> memref<1x256xf32, #tpu.memory_space<any>>
    %10 = tpu.memref_slice %arg2[%c2_i32] : memref<8x!tpu.dma_semaphore, #tpu.memory_space<semaphore_mem>> -> memref<1x!tpu.dma_semaphore, #tpu.memory_space<semaphore_mem>>
    %11 = tpu.memref_squeeze %10 : memref<1x!tpu.dma_semaphore, #tpu.memory_space<semaphore_mem>> -> memref<!tpu.dma_semaphore, #tpu.memory_space<semaphore_mem>>
    tpu.enqueue_dma source(%8 : memref<1x256xf32, #tpu.memory_space<any>>) target(%9 : memref<1x256xf32, #tpu.memory_space<any>>) target_semaphore(%11 : memref<!tpu.dma_semaphore, #tpu.memory_space<semaphore_mem>>)
    %c3_i32 = arith.constant 3 : i32
    %c3_i32_12 = arith.constant 3 : i32
    %c0_i32_13 = arith.constant 0 : i32
    %12 = tpu.memref_slice %arg0[%c3_i32_12, %c0_i32_13] : memref<8x256xf32, #tpu.memory_space<any>> -> memref<1x256xf32, #tpu.memory_space<any>>
    %c3_i32_14 = arith.constant 3 : i32
    %c0_i32_15 = arith.constant 0 : i32
    %13 = tpu.memref_slice %arg1[%c3_i32_14, %c0_i32_15] : memref<8x256xf32, #tpu.memory_space<any>> -> memref<1x256xf32, #tpu.memory_space<any>>
    %14 = tpu.memref_slice %arg2[%c3_i32] : memref<8x!tpu.dma_semaphore, #tpu.memory_space<semaphore_mem>> -> memref<1x!tpu.dma_semaphore, #tpu.memory_space<semaphore_mem>>
    %15 = tpu.memref_squeeze %14 : memref<1x!tpu.dma_semaphore, #tpu.memory_space<semaphore_mem>> -> memref<!tpu.dma_semaphore, #tpu.memory_space<semaphore_mem>>
    tpu.enqueue_dma source(%12 : memref<1x256xf32, #tpu.memory_space<any>>) target(%13 : memref<1x256xf32, #tpu.memory_space<any>>) target_semaphore(%15 : memref<!tpu.dma_semaphore, #tpu.memory_space<semaphore_mem>>)
    %c4_i32 = arith.constant 4 : i32
    %c4_i32_16 = arith.constant 4 : i32
    %c0_i32_17 = arith.constant 0 : i32
    %16 = tpu.memref_slice %arg0[%c4_i32_16, %c0_i32_17] : memref<8x256xf32, #tpu.memory_space<any>> -> memref<1x256xf32, #tpu.memory_space<any>>
    %c4_i32_18 = arith.constant 4 : i32
    %c0_i32_19 = arith.constant 0 : i32
    %17 = tpu.memref_slice %arg1[%c4_i32_18, %c0_i32_19] : memref<8x256xf32, #tpu.memory_space<any>> -> memref<1x256xf32, #tpu.memory_space<any>>
    %18 = tpu.memref_slice %arg2[%c4_i32] : memref<8x!tpu.dma_semaphore, #tpu.memory_space<semaphore_mem>> -> memref<1x!tpu.dma_semaphore, #tpu.memory_space<semaphore_mem>>
    %19 = tpu.memref_squeeze %18 : memref<1x!tpu.dma_semaphore, #tpu.memory_space<semaphore_mem>> -> memref<!tpu.dma_semaphore, #tpu.memory_space<semaphore_mem>>
    tpu.enqueue_dma source(%16 : memref<1x256xf32, #tpu.memory_space<any>>) target(%17 : memref<1x256xf32, #tpu.memory_space<any>>) target_semaphore(%19 : memref<!tpu.dma_semaphore, #tpu.memory_space<semaphore_mem>>)
    %c5_i32 = arith.constant 5 : i32
    %c5_i32_20 = arith.constant 5 : i32
    %c0_i32_21 = arith.constant 0 : i32
    %20 = tpu.memref_slice %arg0[%c5_i32_20, %c0_i32_21] : memref<8x256xf32, #tpu.memory_space<any>> -> memref<1x256xf32, #tpu.memory_space<any>>
    %c5_i32_22 = arith.constant 5 : i32
    %c0_i32_23 = arith.constant 0 : i32
    %21 = tpu.memref_slice %arg1[%c5_i32_22, %c0_i32_23] : memref<8x256xf32, #tpu.memory_space<any>> -> memref<1x256xf32, #tpu.memory_space<any>>
    %22 = tpu.memref_slice %arg2[%c5_i32] : memref<8x!tpu.dma_semaphore, #tpu.memory_space<semaphore_mem>> -> memref<1x!tpu.dma_semaphore, #tpu.memory_space<semaphore_mem>>
    %23 = tpu.memref_squeeze %22 : memref<1x!tpu.dma_semaphore, #tpu.memory_space<semaphore_mem>> -> memref<!tpu.dma_semaphore, #tpu.memory_space<semaphore_mem>>
    tpu.enqueue_dma source(%20 : memref<1x256xf32, #tpu.memory_space<any>>) target(%21 : memref<1x256xf32, #tpu.memory_space<any>>) target_semaphore(%23 : memref<!tpu.dma_semaphore, #tpu.memory_space<semaphore_mem>>)
    %c6_i32 = arith.constant 6 : i32
    %c6_i32_24 = arith.constant 6 : i32
    %c0_i32_25 = arith.constant 0 : i32
    %24 = tpu.memref_slice %arg0[%c6_i32_24, %c0_i32_25] : memref<8x256xf32, #tpu.memory_space<any>> -> memref<1x256xf32, #tpu.memory_space<any>>
    %c6_i32_26 = arith.constant 6 : i32
    %c0_i32_27 = arith.constant 0 : i32
    %25 = tpu.memref_slice %arg1[%c6_i32_26, %c0_i32_27] : memref<8x256xf32, #tpu.memory_space<any>> -> memref<1x256xf32, #tpu.memory_space<any>>
    %26 = tpu.memref_slice %arg2[%c6_i32] : memref<8x!tpu.dma_semaphore, #tpu.memory_space<semaphore_mem>> -> memref<1x!tpu.dma_semaphore, #tpu.memory_space<semaphore_mem>>
    %27 = tpu.memref_squeeze %26 : memref<1x!tpu.dma_semaphore, #tpu.memory_space<semaphore_mem>> -> memref<!tpu.dma_semaphore, #tpu.memory_space<semaphore_mem>>
    tpu.enqueue_dma source(%24 : memref<1x256xf32, #tpu.memory_space<any>>) target(%25 : memref<1x256xf32, #tpu.memory_space<any>>) target_semaphore(%27 : memref<!tpu.dma_semaphore, #tpu.memory_space<semaphore_mem>>)
    %c7_i32 = arith.constant 7 : i32
    %c7_i32_28 = arith.constant 7 : i32
    %c0_i32_29 = arith.constant 0 : i32
    %28 = tpu.memref_slice %arg0[%c7_i32_28, %c0_i32_29] : memref<8x256xf32, #tpu.memory_space<any>> -> memref<1x256xf32, #tpu.memory_space<any>>
    %c7_i32_30 = arith.constant 7 : i32
    %c0_i32_31 = arith.constant 0 : i32
    %29 = tpu.memref_slice %arg1[%c7_i32_30, %c0_i32_31] : memref<8x256xf32, #tpu.memory_space<any>> -> memref<1x256xf32, #tpu.memory_space<any>>
    %30 = tpu.memref_slice %arg2[%c7_i32] : memref<8x!tpu.dma_semaphore, #tpu.memory_space<semaphore_mem>> -> memref<1x!tpu.dma_semaphore, #tpu.memory_space<semaphore_mem>>
    %31 = tpu.memref_squeeze %30 : memref<1x!tpu.dma_semaphore, #tpu.memory_space<semaphore_mem>> -> memref<!tpu.dma_semaphore, #tpu.memory_space<semaphore_mem>>
    tpu.enqueue_dma source(%28 : memref<1x256xf32, #tpu.memory_space<any>>) target(%29 : memref<1x256xf32, #tpu.memory_space<any>>) target_semaphore(%31 : memref<!tpu.dma_semaphore, #tpu.memory_space<semaphore_mem>>)
    %c0_i32_32 = arith.constant 0 : i32
    %c0_i32_33 = arith.constant 0 : i32
    %c0_i32_34 = arith.constant 0 : i32
    %32 = tpu.memref_slice %arg0[%c0_i32_33, %c0_i32_34] : memref<8x256xf32, #tpu.memory_space<any>> -> memref<1x256xf32, #tpu.memory_space<any>>
    %c0_i32_35 = arith.constant 0 : i32
    %c0_i32_36 = arith.constant 0 : i32
    %33 = tpu.memref_slice %arg1[%c0_i32_35, %c0_i32_36] : memref<8x256xf32, #tpu.memory_space<any>> -> memref<1x256xf32, #tpu.memory_space<any>>
    %34 = tpu.memref_slice %arg2[%c0_i32_32] : memref<8x!tpu.dma_semaphore, #tpu.memory_space<semaphore_mem>> -> memref<1x!tpu.dma_semaphore, #tpu.memory_space<semaphore_mem>>
    %35 = tpu.memref_squeeze %34 : memref<1x!tpu.dma_semaphore, #tpu.memory_space<semaphore_mem>> -> memref<!tpu.dma_semaphore, #tpu.memory_space<semaphore_mem>>
    tpu.wait_dma2 semaphore(%35 : memref<!tpu.dma_semaphore, #tpu.memory_space<semaphore_mem>>) src(%32 : memref<1x256xf32, #tpu.memory_space<any>>) dst(%33 : memref<1x256xf32, #tpu.memory_space<any>>)
    %c1_i32_37 = arith.constant 1 : i32
    %c1_i32_38 = arith.constant 1 : i32
    %c0_i32_39 = arith.constant 0 : i32
    %36 = tpu.memref_slice %arg0[%c1_i32_38, %c0_i32_39] : memref<8x256xf32, #tpu.memory_space<any>> -> memref<1x256xf32, #tpu.memory_space<any>>
    %c1_i32_40 = arith.constant 1 : i32
    %c0_i32_41 = arith.constant 0 : i32
    %37 = tpu.memref_slice %arg1[%c1_i32_40, %c0_i32_41] : memref<8x256xf32, #tpu.memory_space<any>> -> memref<1x256xf32, #tpu.memory_space<any>>
    %38 = tpu.memref_slice %arg2[%c1_i32_37] : memref<8x!tpu.dma_semaphore, #tpu.memory_space<semaphore_mem>> -> memref<1x!tpu.dma_semaphore, #tpu.memory_space<semaphore_mem>>
    %39 = tpu.memref_squeeze %38 : memref<1x!tpu.dma_semaphore, #tpu.memory_space<semaphore_mem>> -> memref<!tpu.dma_semaphore, #tpu.memory_space<semaphore_mem>>
    tpu.wait_dma2 semaphore(%39 : memref<!tpu.dma_semaphore, #tpu.memory_space<semaphore_mem>>) src(%36 : memref<1x256xf32, #tpu.memory_space<any>>) dst(%37 : memref<1x256xf32, #tpu.memory_space<any>>)
    %c2_i32_42 = arith.constant 2 : i32
    %c2_i32_43 = arith.constant 2 : i32
    %c0_i32_44 = arith.constant 0 : i32
    %40 = tpu.memref_slice %arg0[%c2_i32_43, %c0_i32_44] : memref<8x256xf32, #tpu.memory_space<any>> -> memref<1x256xf32, #tpu.memory_space<any>>
    %c2_i32_45 = arith.constant 2 : i32
    %c0_i32_46 = arith.constant 0 : i32
    %41 = tpu.memref_slice %arg1[%c2_i32_45, %c0_i32_46] : memref<8x256xf32, #tpu.memory_space<any>> -> memref<1x256xf32, #tpu.memory_space<any>>
    %42 = tpu.memref_slice %arg2[%c2_i32_42] : memref<8x!tpu.dma_semaphore, #tpu.memory_space<semaphore_mem>> -> memref<1x!tpu.dma_semaphore, #tpu.memory_space<semaphore_mem>>
    %43 = tpu.memref_squeeze %42 : memref<1x!tpu.dma_semaphore, #tpu.memory_space<semaphore_mem>> -> memref<!tpu.dma_semaphore, #tpu.memory_space<semaphore_mem>>
    tpu.wait_dma2 semaphore(%43 : memref<!tpu.dma_semaphore, #tpu.memory_space<semaphore_mem>>) src(%40 : memref<1x256xf32, #tpu.memory_space<any>>) dst(%41 : memref<1x256xf32, #tpu.memory_space<any>>)
    %c3_i32_47 = arith.constant 3 : i32
    %c3_i32_48 = arith.constant 3 : i32
    %c0_i32_49 = arith.constant 0 : i32
    %44 = tpu.memref_slice %arg0[%c3_i32_48, %c0_i32_49] : memref<8x256xf32, #tpu.memory_space<any>> -> memref<1x256xf32, #tpu.memory_space<any>>
    %c3_i32_50 = arith.constant 3 : i32
    %c0_i32_51 = arith.constant 0 : i32
    %45 = tpu.memref_slice %arg1[%c3_i32_50, %c0_i32_51] : memref<8x256xf32, #tpu.memory_space<any>> -> memref<1x256xf32, #tpu.memory_space<any>>
    %46 = tpu.memref_slice %arg2[%c3_i32_47] : memref<8x!tpu.dma_semaphore, #tpu.memory_space<semaphore_mem>> -> memref<1x!tpu.dma_semaphore, #tpu.memory_space<semaphore_mem>>
    %47 = tpu.memref_squeeze %46 : memref<1x!tpu.dma_semaphore, #tpu.memory_space<semaphore_mem>> -> memref<!tpu.dma_semaphore, #tpu.memory_space<semaphore_mem>>
    tpu.wait_dma2 semaphore(%47 : memref<!tpu.dma_semaphore, #tpu.memory_space<semaphore_mem>>) src(%44 : memref<1x256xf32, #tpu.memory_space<any>>) dst(%45 : memref<1x256xf32, #tpu.memory_space<any>>)
    %c4_i32_52 = arith.constant 4 : i32
    %c4_i32_53 = arith.constant 4 : i32
    %c0_i32_54 = arith.constant 0 : i32
    %48 = tpu.memref_slice %arg0[%c4_i32_53, %c0_i32_54] : memref<8x256xf32, #tpu.memory_space<any>> -> memref<1x256xf32, #tpu.memory_space<any>>
    %c4_i32_55 = arith.constant 4 : i32
    %c0_i32_56 = arith.constant 0 : i32
    %49 = tpu.memref_slice %arg1[%c4_i32_55, %c0_i32_56] : memref<8x256xf32, #tpu.memory_space<any>> -> memref<1x256xf32, #tpu.memory_space<any>>
    %50 = tpu.memref_slice %arg2[%c4_i32_52] : memref<8x!tpu.dma_semaphore, #tpu.memory_space<semaphore_mem>> -> memref<1x!tpu.dma_semaphore, #tpu.memory_space<semaphore_mem>>
    %51 = tpu.memref_squeeze %50 : memref<1x!tpu.dma_semaphore, #tpu.memory_space<semaphore_mem>> -> memref<!tpu.dma_semaphore, #tpu.memory_space<semaphore_mem>>
    tpu.wait_dma2 semaphore(%51 : memref<!tpu.dma_semaphore, #tpu.memory_space<semaphore_mem>>) src(%48 : memref<1x256xf32, #tpu.memory_space<any>>) dst(%49 : memref<1x256xf32, #tpu.memory_space<any>>)
    %c5_i32_57 = arith.constant 5 : i32
    %c5_i32_58 = arith.constant 5 : i32
    %c0_i32_59 = arith.constant 0 : i32
    %52 = tpu.memref_slice %arg0[%c5_i32_58, %c0_i32_59] : memref<8x256xf32, #tpu.memory_space<any>> -> memref<1x256xf32, #tpu.memory_space<any>>
    %c5_i32_60 = arith.constant 5 : i32
    %c0_i32_61 = arith.constant 0 : i32
    %53 = tpu.memref_slice %arg1[%c5_i32_60, %c0_i32_61] : memref<8x256xf32, #tpu.memory_space<any>> -> memref<1x256xf32, #tpu.memory_space<any>>
    %54 = tpu.memref_slice %arg2[%c5_i32_57] : memref<8x!tpu.dma_semaphore, #tpu.memory_space<semaphore_mem>> -> memref<1x!tpu.dma_semaphore, #tpu.memory_space<semaphore_mem>>
    %55 = tpu.memref_squeeze %54 : memref<1x!tpu.dma_semaphore, #tpu.memory_space<semaphore_mem>> -> memref<!tpu.dma_semaphore, #tpu.memory_space<semaphore_mem>>
    tpu.wait_dma2 semaphore(%55 : memref<!tpu.dma_semaphore, #tpu.memory_space<semaphore_mem>>) src(%52 : memref<1x256xf32, #tpu.memory_space<any>>) dst(%53 : memref<1x256xf32, #tpu.memory_space<any>>)
    %c6_i32_62 = arith.constant 6 : i32
    %c6_i32_63 = arith.constant 6 : i32
    %c0_i32_64 = arith.constant 0 : i32
    %56 = tpu.memref_slice %arg0[%c6_i32_63, %c0_i32_64] : memref<8x256xf32, #tpu.memory_space<any>> -> memref<1x256xf32, #tpu.memory_space<any>>
    %c6_i32_65 = arith.constant 6 : i32
    %c0_i32_66 = arith.constant 0 : i32
    %57 = tpu.memref_slice %arg1[%c6_i32_65, %c0_i32_66] : memref<8x256xf32, #tpu.memory_space<any>> -> memref<1x256xf32, #tpu.memory_space<any>>
    %58 = tpu.memref_slice %arg2[%c6_i32_62] : memref<8x!tpu.dma_semaphore, #tpu.memory_space<semaphore_mem>> -> memref<1x!tpu.dma_semaphore, #tpu.memory_space<semaphore_mem>>
    %59 = tpu.memref_squeeze %58 : memref<1x!tpu.dma_semaphore, #tpu.memory_space<semaphore_mem>> -> memref<!tpu.dma_semaphore, #tpu.memory_space<semaphore_mem>>
    tpu.wait_dma2 semaphore(%59 : memref<!tpu.dma_semaphore, #tpu.memory_space<semaphore_mem>>) src(%56 : memref<1x256xf32, #tpu.memory_space<any>>) dst(%57 : memref<1x256xf32, #tpu.memory_space<any>>)
    %c7_i32_67 = arith.constant 7 : i32
    %c7_i32_68 = arith.constant 7 : i32
    %c0_i32_69 = arith.constant 0 : i32
    %60 = tpu.memref_slice %arg0[%c7_i32_68, %c0_i32_69] : memref<8x256xf32, #tpu.memory_space<any>> -> memref<1x256xf32, #tpu.memory_space<any>>
    %c7_i32_70 = arith.constant 7 : i32
    %c0_i32_71 = arith.constant 0 : i32
    %61 = tpu.memref_slice %arg1[%c7_i32_70, %c0_i32_71] : memref<8x256xf32, #tpu.memory_space<any>> -> memref<1x256xf32, #tpu.memory_space<any>>
    %62 = tpu.memref_slice %arg2[%c7_i32_67] : memref<8x!tpu.dma_semaphore, #tpu.memory_space<semaphore_mem>> -> memref<1x!tpu.dma_semaphore, #tpu.memory_space<semaphore_mem>>
    %63 = tpu.memref_squeeze %62 : memref<1x!tpu.dma_semaphore, #tpu.memory_space<semaphore_mem>> -> memref<!tpu.dma_semaphore, #tpu.memory_space<semaphore_mem>>
    tpu.wait_dma2 semaphore(%63 : memref<!tpu.dma_semaphore, #tpu.memory_space<semaphore_mem>>) src(%60 : memref<1x256xf32, #tpu.memory_space<any>>) dst(%61 : memref<1x256xf32, #tpu.memory_space<any>>)
    return
  }
}

</mosaic_0001>

<bundles_post_ra>
// kernel: flatten_layer.1
= control target key start
LH: loop header
LB: loop body
LE: loop exit
PB: predicated region body
PF: predicated region fallthrough
CT: control target
= control target key end

     0   :  { %s763_s0 = inlined_call_operand.vmem [shape: f32[8,256], index: 0, kind: input, shape index: {}]   ;;  %s764_s1 = inlined_call_operand.vmem [shape: f32[8,256], index: 1, kind: output, shape index: {}]  }
   0x1   :  { %v23_v0 = vld [vmem:[%s763_s0] sm:$0x1]  ;;  %v25_v1 = vld [vmem:[%s763_s0 + $0x8] sm:$0x1] }
   0x2   :  { %24 = vst [vmem:[%s764_s1] sm:$0x1] %v23_v0  ;;  %26 = vst [vmem:[%s764_s1 + $0x8] sm:$0x1] %v25_v1 }
   0x3   :  { %53 = vsyncadd [#allocation2], 32  ;;  %v581_v2 = vld [vmem:[%s763_s0 + $0x1] sm:$0x1]  ;;  %v583_v3 = vld [vmem:[%s763_s0 + $0x9] sm:$0x1] }
   0x4   :  { %582 = vst [vmem:[%s764_s1 + $0x1] sm:$0x1] %v581_v2  ;;  %584 = vst [vmem:[%s764_s1 + $0x9] sm:$0x1] %v583_v3 }
   0x5   :  { %104 = vsyncadd [#allocation2 + $0x1], 32  ;;  %v589_v4 = vld [vmem:[%s763_s0 + $0x2] sm:$0x1]  ;;  %v591_v5 = vld [vmem:[%s763_s0 + $0xa] sm:$0x1] }
   0x6   :  { %590 = vst [vmem:[%s764_s1 + $0x2] sm:$0x1] %v589_v4  ;;  %592 = vst [vmem:[%s764_s1 + $0xa] sm:$0x1] %v591_v5 }
   0x7   :  { %155 = vsyncadd [#allocation2 + $0x2], 32  ;;  %v597_v6 = vld [vmem:[%s763_s0 + $0x3] sm:$0x1]  ;;  %v599_v7 = vld [vmem:[%s763_s0 + $0xb] sm:$0x1] }
   0x8   :  { %598 = vst [vmem:[%s764_s1 + $0x3] sm:$0x1] %v597_v6  ;;  %600 = vst [vmem:[%s764_s1 + $0xb] sm:$0x1] %v599_v7 }
   0x9   :  { %206 = vsyncadd [#allocation2 + $0x3], 32  ;;  %v605_v8 = vld [vmem:[%s763_s0 + $0x4] sm:$0x1]  ;;  %v607_v9 = vld [vmem:[%s763_s0 + $0xc] sm:$0x1] }
   0xa   :  { %606 = vst [vmem:[%s764_s1 + $0x4] sm:$0x1] %v605_v8  ;;  %608 = vst [vmem:[%s764_s1 + $0xc] sm:$0x1] %v607_v9 }
   0xb   :  { %257 = vsyncadd [#allocation2 + $0x4], 32  ;;  %v613_v10 = vld [vmem:[%s763_s0 + $0x5] sm:$0x1]  ;;  %v615_v11 = vld [vmem:[%s763_s0 + $0xd] sm:$0x1] }
   0xc   :  { %614 = vst [vmem:[%s764_s1 + $0x5] sm:$0x1] %v613_v10  ;;  %616 = vst [vmem:[%s764_s1 + $0xd] sm:$0x1] %v615_v11 }
   0xd   :  { %308 = vsyncadd [#allocation2 + $0x5], 32  ;;  %v621_v12 = vld [vmem:[%s763_s0 + $0x6] sm:$0x1]  ;;  %v623_v13 = vld [vmem:[%s763_s0 + $0xe] sm:$0x1] }
   0xe   :  { %622 = vst [vmem:[%s764_s1 + $0x6] sm:$0x1] %v621_v12  ;;  %624 = vst [vmem:[%s764_s1 + $0xe] sm:$0x1] %v623_v13 }
   0xf   :  { %359 = vsyncadd [#allocation2 + $0x6], 32  ;;  %v629_v14 = vld [vmem:[%s763_s0 + $0x7] sm:$0x1]  ;;  %v631_v15 = vld [vmem:[%s763_s0 + $0xf] sm:$0x1] }
  0x10   :  { %630 = vst [vmem:[%s764_s1 + $0x7] sm:$0x1] %v629_v14  ;;  %632 = vst [vmem:[%s764_s1 + $0xf] sm:$0x1] %v631_v15 }
  0x11   :  { %410 = vsyncadd [#allocation2 + $0x7], 32 }
  0x12   :  { %641 = dma.done.wait [#allocation2], 32 }
  0x13   :  { %642 = vsyncadd [#allocation2], 4294967264 }
  0x14   :  { %643 = dma.done.wait [#allocation2 + $0x1], 32 }
  0x15   :  { %644 = vsyncadd [#allocation2 + $0x1], 4294967264 }
  0x16   :  { %645 = dma.done.wait [#allocation2 + $0x2], 32 }
  0x17   :  { %646 = vsyncadd [#allocation2 + $0x2], 4294967264 }
  0x18   :  { %647 = dma.done.wait [#allocation2 + $0x3], 32 }
  0x19   :  { %648 = vsyncadd [#allocation2 + $0x3], 4294967264 }
  0x1a   :  { %649 = dma.done.wait [#allocation2 + $0x4], 32 }
  0x1b   :  { %650 = vsyncadd [#allocation2 + $0x4], 4294967264 }
  0x1c   :  { %651 = dma.done.wait [#allocation2 + $0x5], 32 }
  0x1d   :  { %652 = vsyncadd [#allocation2 + $0x5], 4294967264 }
  0x1e   :  { %653 = dma.done.wait [#allocation2 + $0x6], 32 }
  0x1f   :  { %654 = vsyncadd [#allocation2 + $0x6], 4294967264 }
  0x20   :  { %655 = dma.done.wait [#allocation2 + $0x7], 32 }
  0x21   :  { %656 = vsyncadd [#allocation2 + $0x7], 4294967264 }
  0x22   :  { %428 = vsyncmov [#allocation2] }
  0x25   :  { %s429_s0 = vpop.sfrf %428 }
  0x26   :  { %p633_p0 = scmp.ne.s32.totalorder %s429_s0, 0 }
  0x28   :  { %433 = shalt.err (%p633_p0)  }
  0x29   :  { %435 = vsyncmov [#allocation2 + $0x1] }
  0x2c   :  { %s436_s1 = vpop.sfrf %435 }
  0x2d   :  { %p634_p1 = scmp.ne.s32.totalorder %s436_s1, 0 }
  0x2f   :  { %440 = shalt.err (%p634_p1)  }
  0x30   :  { %442 = vsyncmov [#allocation2 + $0x2] }
  0x33   :  { %s443_s12 = vpop.sfrf %442 }
  0x34   :  { %p635_p2 = scmp.ne.s32.totalorder %s443_s12, 0 }
  0x36   :  { %447 = shalt.err (%p635_p2)  }
  0x37   :  { %449 = vsyncmov [#allocation2 + $0x3] }
  0x3a   :  { %s450_s13 = vpop.sfrf %449 }
  0x3b   :  { %p636_p3 = scmp.ne.s32.totalorder %s450_s13, 0 }
  0x3d   :  { %454 = shalt.err (%p636_p3)  }
  0x3e   :  { %456 = vsyncmov [#allocation2 + $0x4] }
  0x41   :  { %s457_s14 = vpop.sfrf %456 }
  0x42   :  { %p637_p4 = scmp.ne.s32.totalorder %s457_s14, 0 }
  0x44   :  { %461 = shalt.err (%p637_p4)  }
  0x45   :  { %463 = vsyncmov [#allocation2 + $0x5] }
  0x48   :  { %s464_s15 = vpop.sfrf %463 }
  0x49   :  { %p638_p5 = scmp.ne.s32.totalorder %s464_s15, 0 }
  0x4b   :  { %468 = shalt.err (%p638_p5)  }
  0x4c   :  { %470 = vsyncmov [#allocation2 + $0x6] }
  0x4f   :  { %s471_s16 = vpop.sfrf %470 }
  0x50   :  { %p639_p6 = scmp.ne.s32.totalorder %s471_s16, 0 }
  0x52   :  { %475 = shalt.err (%p639_p6)  }
  0x53   :  { %477 = vsyncmov [#allocation2 + $0x7] }
  0x56   :  { %s478_s17 = vpop.sfrf %477 }
  0x57   :  { %p640_p7 = scmp.ne.s32.totalorder %s478_s17, 0 }
  0x59   :  { %482 = shalt.err (%p640_p7)  }

</bundles_post_ra>
